<compile_context>
chip_gen: v7x
topology: tpu7x:2x2x1
jax: 0.10.0
libtpu: 0.0.40
codegen_flags: <defaults>
</compile_context>

<pallas_src>
import functools
import math

import jax
import jax.numpy as jnp
from jax import lax
from jax.experimental import pallas as pl
from jax.experimental.pallas import tpu as pltpu

LN_EPS = 1e-5
LANE = 128
SUBLANE = 8
# Keep the whole weight stack VMEM-resident below this size (safe on every
# TPU generation, including v7x's 64 MiB per-TensorCore VMEM).
RESIDENT_WEIGHT_BYTES = 24 * 2**20


def _round_up(x, m):
    return (x + m - 1) // m * m


def _physical_vmem_bytes():
    try:
        return int(pltpu.get_tpu_info().vmem_capacity_bytes)
    except Exception:
        return 64 * 2**20  # conservative fallback (v7x per-TensorCore VMEM)


def _layer_math(act, w, params, d_real):
    """One Linear -> LayerNorm -> ReLU step on a (TM, D_pad) f32 tile.

    `w` is a (D_pad, D_pad) bf16 tile, `params` a (3, D_pad) f32 tile holding
    [bias; gamma; beta].  Padded feature lanes of the result stay exactly 0
    because weights/bias/gamma/beta are zero on padded lanes.
    """
    # MXU: bf16 operands, f32 accumulation.
    y = jnp.dot(act.astype(w.dtype), w, preferred_element_type=jnp.float32)
    bias = params[0:1]
    gamma = params[1:2]
    beta = params[2:3]
    y = y + bias

    # LayerNorm over the REAL feature count.  Padded lanes of y are exactly 0,
    # so full-lane sums equal sums over the real features (no mask needed).
    inv_d = jnp.float32(1.0 / d_real)
    mean = jnp.sum(y, axis=-1, keepdims=True) * inv_d
    mean_sq = jnp.sum(y * y, axis=-1, keepdims=True) * inv_d
    rstd = lax.rsqrt(mean_sq - mean * mean + LN_EPS)       # EUP rsqrt
    # gamma/beta are zero-padded -> padded lanes return to exactly 0.
    y = (y - mean) * rstd * gamma + beta
    return jnp.maximum(y, 0.0)                             # ReLU


def _mlp_resident_kernel(x_ref, w_ref, p_ref, o_ref, *, num_layers, d_real):
    # x_ref: (TM, D_pad)        input row tile
    # w_ref: (L, D_pad, D_pad)  ALL layer weights, VMEM-resident (bf16)
    # p_ref: (L, 3, D_pad)      [bias; gamma; beta] per layer (f32)
    # o_ref: (TM, D_pad)        output row tile
    act = x_ref[...].astype(jnp.float32)
    for l in range(num_layers):          # fully unrolled static layer loop
        act = _layer_math(act, w_ref[l], p_ref[l], d_real)
    o_ref[...] = act.astype(o_ref.dtype)


def _mlp_streamed_kernel(x_ref, w_ref, p_ref, o_ref, *, d_real):
    # Weights streamed per layer over grid axis 1.  o_ref doubles as the
    # layer-resident activation buffer: its block index is constant along the
    # layer axis, so it only flushes to HBM once per row tile, and the last
    # layer does exactly one full-tile store.
    l = pl.program_id(1)

    @pl.when(l == 0)
    def _():
        o_ref[...] = x_ref[...]

    act = o_ref[...].astype(jnp.float32)
    y = _layer_math(act, w_ref[0], p_ref[0], d_real)
    o_ref[...] = y.astype(o_ref.dtype)


@functools.partial(jax.jit, static_argnames=("in_size", "out_size", "tile_m"))
def mlp_forward(x, w_s, p_s, *, in_size, out_size, tile_m=None):
    """Fused multi-layer MLP forward.

    w_s: (L, D_pad, D_pad) zero-padded stacked weights (bf16, (in, out) layout).
    p_s: (L, 3, D_pad) zero-padded [bias; LN-gamma; LN-beta] per layer (f32).
    """
    n, d_in = x.shape
    assert d_in == in_size
    num_layers, d_pad, _ = w_s.shape

    phys_vmem = _physical_vmem_bytes()
    if tile_m is None:
        # Bigger row tiles amortize per-step overhead / weight re-streaming;
        # only on 128 MiB parts (v5e/v6e).  v7x (64 MiB) stays at 256.
        tile_m = 512 if phys_vmem >= 96 * 2**20 else 256

    # Row tiling: multiple of 8 sublanes, capped at tile_m.
    n_pad = _round_up(max(n, SUBLANE), SUBLANE)
    tm = min(_round_up(tile_m, SUBLANE), n_pad)
    n_pad = _round_up(n_pad, tm)

    # Zero-pad rows and feature lanes (padded lanes stay 0 through all layers).
    x_p = jnp.zeros((n_pad, d_pad), x.dtype).at[:n, :d_in].set(x)

    itemsize_x = jnp.dtype(x.dtype).itemsize
    itemsize_w = jnp.dtype(w_s.dtype).itemsize
    itemsize_p = jnp.dtype(p_s.dtype).itemsize
    row_tiles = n_pad // tm
    weight_bytes = num_layers * d_pad * d_pad * itemsize_w
    param_bytes = num_layers * 3 * d_pad * itemsize_p
    resident = weight_bytes <= RESIDENT_WEIGHT_BYTES

    flops = 2 * n_pad * d_pad * d_pad * num_layers

    if resident:
        # Whole weight/param stacks VMEM-resident, layer loop inside one step.
        grid = (row_tiles,)
        in_specs = [
            pl.BlockSpec((tm, d_pad), lambda i: (i, 0)),
            pl.BlockSpec((num_layers, d_pad, d_pad), lambda i: (0, 0, 0)),
            pl.BlockSpec((num_layers, 3, d_pad), lambda i: (0, 0, 0)),
        ]
        out_specs = pl.BlockSpec((tm, d_pad), lambda i: (i, 0))
        kernel = functools.partial(
            _mlp_resident_kernel, num_layers=num_layers, d_real=out_size)
        dim_sem = ("parallel",)
        vmem_need = (
            4 * tm * d_pad * itemsize_x        # x + out tiles, double-buffered
            + 2 * weight_bytes                 # weight stack (worst-case 2 bufs)
            + 2 * param_bytes
            + 3 * tm * d_pad * 4               # f32 temporaries headroom
        )
        bytes_accessed = 2 * n_pad * d_pad * itemsize_x + weight_bytes + param_bytes
    else:
        # Stream per-layer weights over a trailing "arbitrary" grid axis.
        # TODO(synk): add pipeline_mode=pl.Buffered(3) to the weight spec on
        # v5e/v6e if the per-layer weight DMA is ever exposed at small tm.
        grid = (row_tiles, num_layers)
        in_specs = [
            # x re-DMAs only when the row-tile index changes (not per layer).
            pl.BlockSpec((tm, d_pad), lambda i, l: (i, 0)),
            pl.BlockSpec((1, d_pad, d_pad), lambda i, l: (l, 0, 0)),
            pl.BlockSpec((1, 3, d_pad), lambda i, l: (l, 0, 0)),
        ]
        out_specs = pl.BlockSpec((tm, d_pad), lambda i, l: (i, 0))
        kernel = functools.partial(_mlp_streamed_kernel, d_real=out_size)
        dim_sem = ("parallel", "arbitrary")
        vmem_need = (
            4 * tm * d_pad * itemsize_x
            + 2 * d_pad * d_pad * itemsize_w
            + 2 * 3 * d_pad * itemsize_p
            + 3 * tm * d_pad * 4
        )
        bytes_accessed = (2 * n_pad * d_pad * itemsize_x
                          + row_tiles * (weight_bytes + param_bytes))

    # Never hand the compiler all of physical VMEM (leave headroom for its own
    # scratch): v7x has 64 MiB/TC, v5e/v6e have 128 MiB.
    vmem_cap = int(phys_vmem * 0.8)
    vmem_limit = int(min(max(2 * vmem_need, 32 * 2**20), vmem_cap))

    out = pl.pallas_call(
        kernel,
        out_shape=jax.ShapeDtypeStruct((n_pad, d_pad), x.dtype),
        grid_spec=pltpu.PrefetchScalarGridSpec(
            num_scalar_prefetch=0,
            grid=grid,
            in_specs=in_specs,
            out_specs=out_specs,
        ),
        compiler_params=pltpu.CompilerParams(
            dimension_semantics=dim_sem,
            vmem_limit_bytes=vmem_limit,
        ),
        cost_estimate=pl.CostEstimate(
            flops=int(flops),
            transcendentals=int(n_pad * num_layers),
            bytes_accessed=int(bytes_accessed),
        ),
    )(x_p, w_s, p_s)

    return out[:n, :out_size]


def init_mlp_params(key, in_size, out_size, loop):
    """Raw per-layer params matching the PyTorch module (W stored as (in, out))."""
    params = []
    d_in = in_size
    for _ in range(loop):
        key, kw, kb = jax.random.split(key, 3)
        bound = 1.0 / math.sqrt(d_in)            # nn.Linear default init
        w = jax.random.uniform(kw, (d_in, out_size), jnp.float32, -bound, bound)
        b = jax.random.uniform(kb, (out_size,), jnp.float32, -bound, bound)
        gamma = jnp.ones((out_size,), jnp.float32)    # LayerNorm defaults
        beta = jnp.zeros((out_size,), jnp.float32)
        params.append((w, b, gamma, beta))
        d_in = out_size
    return params


def pack_params(params, in_size, out_size, weight_dtype=jnp.bfloat16):
    """Zero-pad each layer to (D_pad, D_pad), stack along a layer axis (bf16
    weights for the MXU), and merge [bias, gamma, beta] into one (L, 3, D_pad)
    f32 array (single param DMA per layer)."""
    d_pad = _round_up(max(in_size, out_size), LANE)
    ws, ps = [], []
    for (w, b, gamma, beta) in params:
        di, do = w.shape
        wp = jnp.zeros((d_pad, d_pad), jnp.float32).at[:di, :do].set(w)
        ws.append(wp.astype(weight_dtype))
        p = jnp.zeros((3, d_pad), jnp.float32)
        p = p.at[0, :do].set(b).at[1, :do].set(gamma).at[2, :do].set(beta)
        ps.append(p)
    return jnp.stack(ws), jnp.stack(ps)


def _reference_mlp(x, params, matmul_dtype=jnp.float32):
    """Pure-JAX reference.  matmul_dtype=bf16 mirrors the kernel's MXU operand
    precision (f32 accumulation, f32 LayerNorm)."""
    act = x
    for (w, b, gamma, beta) in params:
        a = act.astype(matmul_dtype).astype(jnp.float32)
        wq = w.astype(matmul_dtype).astype(jnp.float32)
        y = a @ wq + b
        mean = y.mean(-1, keepdims=True)
        var = ((y - mean) ** 2).mean(-1, keepdims=True)
        y = (y - mean) / jnp.sqrt(var + LN_EPS) * gamma + beta
        act = jnp.maximum(y, 0.0)
    return act


if __name__ == "__main__":
    key = jax.random.PRNGKey(0)
    in_size, out_size, loop = 32, 32, 3
    batch = 8

    key, kx, kp = jax.random.split(key, 3)
    x = jax.random.normal(kx, (batch, in_size), jnp.float32)

    raw_params = init_mlp_params(kp, in_size, out_size, loop)
    w_s, p_s = pack_params(raw_params, in_size, out_size)

    out = mlp_forward(x, w_s, p_s, in_size=in_size, out_size=out_size)
    out = jax.block_until_ready(out)
    assert out.shape == (batch, out_size)

    # Kernel-math check vs a reference with matched bf16 MXU operands.
    ref_matched = _reference_mlp(x, raw_params, matmul_dtype=jnp.bfloat16)
    assert jnp.allclose(out, ref_matched, atol=1e-3, rtol=1e-3), \
        "mismatch vs bf16-matched reference"

    # Loose check vs exact f32 module semantics (bf16 MXU operands introduce a
    # small, expected quantization error).
    ref_f32 = _reference_mlp(x, raw_params)
    assert jnp.allclose(out, ref_f32, atol=6e-2, rtol=6e-2), \
        "mismatch vs f32 reference"

    print("KERNEL_OK")
</pallas_src>

<mosaic_0001>
module attributes {stable_mosaic.version = 11 : i64} {
  func.func @_mlp_resident_kernel(%arg0: i32, %arg1: memref<8x128xf32, #tpu.memory_space<vmem>>, %arg2: memref<3x128x128xbf16, #tpu.memory_space<vmem>>, %arg3: memref<3x3x128xf32, #tpu.memory_space<vmem>>, %arg4: memref<8x128xf32, #tpu.memory_space<vmem>>) attributes {dimension_semantics = [#tpu.dimension_semantics<parallel>], iteration_bounds = array<i64: 1>, scalar_prefetch = 0 : i64, scratch_operands = 0 : i64, tpu.core_type = #tpu.core_type<tc>, window_params = [{transform_indices = @transform_0, window_bounds = array<i64: 8, 128>}, {pipeline_mode = #tpu.pipeline_mode<synchronous>, transform_indices = @transform_1, window_bounds = array<i64: 3, 128, 128>}, {pipeline_mode = #tpu.pipeline_mode<synchronous>, transform_indices = @transform_2, window_bounds = array<i64: 3, 3, 128>}, {transform_indices = @transform_3, window_bounds = array<i64: 8, 128>}]} {
    %c0 = arith.constant 0 : index
    %c0_0 = arith.constant 0 : index
    %0 = vector.load %arg1[%c0, %c0_0] : memref<8x128xf32, #tpu.memory_space<vmem>>, vector<8x128xf32>
    %c0_1 = arith.constant 0 : index
    %c0_2 = arith.constant 0 : index
    %c0_3 = arith.constant 0 : index
    %1 = vector.load %arg2[%c0_1, %c0_2, %c0_3] : memref<3x128x128xbf16, #tpu.memory_space<vmem>>, vector<1x128x128xbf16>
    %2 = vector.shape_cast %1 : vector<1x128x128xbf16> to vector<128x128xbf16>
    %c0_4 = arith.constant 0 : index
    %c0_5 = arith.constant 0 : index
    %c0_6 = arith.constant 0 : index
    %3 = vector.load %arg3[%c0_4, %c0_5, %c0_6] : memref<3x3x128xf32, #tpu.memory_space<vmem>>, vector<1x3x128xf32>
    %4 = vector.shape_cast %3 : vector<1x3x128xf32> to vector<3x128xf32>
    %5 = arith.truncf %0 : vector<8x128xf32> to vector<8x128xbf16>
    %cst = arith.constant dense<0.000000e+00> : vector<8x128xf32>
    %6 = tpu.matmul %5, %2, %cst {dimension_numbers = #tpu.dot_dimension_numbers<[1], [0], [0], [1], [0, 0, 1, 1], [], []>} : vector<8x128xbf16>, vector<128x128xbf16>, vector<8x128xf32> -> vector<8x128xf32>
    %7 = vector.extract_strided_slice %4 {offsets = [0, 0], sizes = [1, 128], strides = [1, 1]} : vector<3x128xf32> to vector<1x128xf32>
    %8 = vector.extract_strided_slice %4 {offsets = [1, 0], sizes = [1, 128], strides = [1, 1]} : vector<3x128xf32> to vector<1x128xf32>
    %9 = vector.extract_strided_slice %4 {offsets = [2, 0], sizes = [1, 128], strides = [1, 1]} : vector<3x128xf32> to vector<1x128xf32>
    %10 = vector.broadcast %7 : vector<1x128xf32> to vector<8x128xf32>
    %11 = arith.addf %6, %10 : vector<8x128xf32>
    %cst_7 = arith.constant dense<0.000000e+00> : vector<8xf32>
    %12 = vector.multi_reduction <add>, %11, %cst_7 [1] : vector<8x128xf32> to vector<8xf32>
    %13 = vector.shape_cast %12 : vector<8xf32> to vector<8x1xf32>
    %cst_8 = arith.constant 3.125000e-02 : f32
    %14 = vector.broadcast %cst_8 : f32 to vector<8x1xf32>
    %15 = arith.mulf %13, %14 : vector<8x1xf32>
    %16 = arith.mulf %11, %11 : vector<8x128xf32>
    %cst_9 = arith.constant dense<0.000000e+00> : vector<8xf32>
    %17 = vector.multi_reduction <add>, %16, %cst_9 [1] : vector<8x128xf32> to vector<8xf32>
    %18 = vector.shape_cast %17 : vector<8xf32> to vector<8x1xf32>
    %cst_10 = arith.constant 3.125000e-02 : f32
    %19 = vector.broadcast %cst_10 : f32 to vector<8x1xf32>
    %20 = arith.mulf %18, %19 : vector<8x1xf32>
    %21 = arith.mulf %15, %15 : vector<8x1xf32>
    %22 = arith.subf %20, %21 : vector<8x1xf32>
    %cst_11 = arith.constant 9.99999974E-6 : f32
    %23 = vector.broadcast %cst_11 : f32 to vector<8x1xf32>
    %24 = arith.addf %22, %23 : vector<8x1xf32>
    %25 = math.rsqrt %24 : vector<8x1xf32>
    %26 = vector.broadcast %15 : vector<8x1xf32> to vector<8x128xf32>
    %27 = arith.subf %11, %26 : vector<8x128xf32>
    %28 = vector.broadcast %25 : vector<8x1xf32> to vector<8x128xf32>
    %29 = arith.mulf %27, %28 : vector<8x128xf32>
    %30 = vector.broadcast %8 : vector<1x128xf32> to vector<8x128xf32>
    %31 = arith.mulf %29, %30 : vector<8x128xf32>
    %32 = vector.broadcast %9 : vector<1x128xf32> to vector<8x128xf32>
    %33 = arith.addf %31, %32 : vector<8x128xf32>
    %cst_12 = arith.constant 0.000000e+00 : f32
    %34 = vector.broadcast %cst_12 : f32 to vector<8x128xf32>
    %35 = arith.maximumf %33, %34 : vector<8x128xf32>
    %c1 = arith.constant 1 : index
    %c0_13 = arith.constant 0 : index
    %c0_14 = arith.constant 0 : index
    %36 = vector.load %arg2[%c1, %c0_13, %c0_14] : memref<3x128x128xbf16, #tpu.memory_space<vmem>>, vector<1x128x128xbf16>
    %37 = vector.shape_cast %36 : vector<1x128x128xbf16> to vector<128x128xbf16>
    %c1_15 = arith.constant 1 : index
    %c0_16 = arith.constant 0 : index
    %c0_17 = arith.constant 0 : index
    %38 = vector.load %arg3[%c1_15, %c0_16, %c0_17] : memref<3x3x128xf32, #tpu.memory_space<vmem>>, vector<1x3x128xf32>
    %39 = vector.shape_cast %38 : vector<1x3x128xf32> to vector<3x128xf32>
    %40 = arith.truncf %35 : vector<8x128xf32> to vector<8x128xbf16>
    %cst_18 = arith.constant dense<0.000000e+00> : vector<8x128xf32>
    %41 = tpu.matmul %40, %37, %cst_18 {dimension_numbers = #tpu.dot_dimension_numbers<[1], [0], [0], [1], [0, 0, 1, 1], [], []>} : vector<8x128xbf16>, vector<128x128xbf16>, vector<8x128xf32> -> vector<8x128xf32>
    %42 = vector.extract_strided_slice %39 {offsets = [0, 0], sizes = [1, 128], strides = [1, 1]} : vector<3x128xf32> to vector<1x128xf32>
    %43 = vector.extract_strided_slice %39 {offsets = [1, 0], sizes = [1, 128], strides = [1, 1]} : vector<3x128xf32> to vector<1x128xf32>
    %44 = vector.extract_strided_slice %39 {offsets = [2, 0], sizes = [1, 128], strides = [1, 1]} : vector<3x128xf32> to vector<1x128xf32>
    %45 = vector.broadcast %42 : vector<1x128xf32> to vector<8x128xf32>
    %46 = arith.addf %41, %45 : vector<8x128xf32>
    %cst_19 = arith.constant dense<0.000000e+00> : vector<8xf32>
    %47 = vector.multi_reduction <add>, %46, %cst_19 [1] : vector<8x128xf32> to vector<8xf32>
    %48 = vector.shape_cast %47 : vector<8xf32> to vector<8x1xf32>
    %cst_20 = arith.constant 3.125000e-02 : f32
    %49 = vector.broadcast %cst_20 : f32 to vector<8x1xf32>
    %50 = arith.mulf %48, %49 : vector<8x1xf32>
    %51 = arith.mulf %46, %46 : vector<8x128xf32>
    %cst_21 = arith.constant dense<0.000000e+00> : vector<8xf32>
    %52 = vector.multi_reduction <add>, %51, %cst_21 [1] : vector<8x128xf32> to vector<8xf32>
    %53 = vector.shape_cast %52 : vector<8xf32> to vector<8x1xf32>
    %cst_22 = arith.constant 3.125000e-02 : f32
    %54 = vector.broadcast %cst_22 : f32 to vector<8x1xf32>
    %55 = arith.mulf %53, %54 : vector<8x1xf32>
    %56 = arith.mulf %50, %50 : vector<8x1xf32>
    %57 = arith.subf %55, %56 : vector<8x1xf32>
    %cst_23 = arith.constant 9.99999974E-6 : f32
    %58 = vector.broadcast %cst_23 : f32 to vector<8x1xf32>
    %59 = arith.addf %57, %58 : vector<8x1xf32>
    %60 = math.rsqrt %59 : vector<8x1xf32>
    %61 = vector.broadcast %50 : vector<8x1xf32> to vector<8x128xf32>
    %62 = arith.subf %46, %61 : vector<8x128xf32>
    %63 = vector.broadcast %60 : vector<8x1xf32> to vector<8x128xf32>
    %64 = arith.mulf %62, %63 : vector<8x128xf32>
    %65 = vector.broadcast %43 : vector<1x128xf32> to vector<8x128xf32>
    %66 = arith.mulf %64, %65 : vector<8x128xf32>
    %67 = vector.broadcast %44 : vector<1x128xf32> to vector<8x128xf32>
    %68 = arith.addf %66, %67 : vector<8x128xf32>
    %cst_24 = arith.constant 0.000000e+00 : f32
    %69 = vector.broadcast %cst_24 : f32 to vector<8x128xf32>
    %70 = arith.maximumf %68, %69 : vector<8x128xf32>
    %c2 = arith.constant 2 : index
    %c0_25 = arith.constant 0 : index
    %c0_26 = arith.constant 0 : index
    %71 = vector.load %arg2[%c2, %c0_25, %c0_26] : memref<3x128x128xbf16, #tpu.memory_space<vmem>>, vector<1x128x128xbf16>
    %72 = vector.shape_cast %71 : vector<1x128x128xbf16> to vector<128x128xbf16>
    %c2_27 = arith.constant 2 : index
    %c0_28 = arith.constant 0 : index
    %c0_29 = arith.constant 0 : index
    %73 = vector.load %arg3[%c2_27, %c0_28, %c0_29] : memref<3x3x128xf32, #tpu.memory_space<vmem>>, vector<1x3x128xf32>
    %74 = vector.shape_cast %73 : vector<1x3x128xf32> to vector<3x128xf32>
    %75 = arith.truncf %70 : vector<8x128xf32> to vector<8x128xbf16>
    %cst_30 = arith.constant dense<0.000000e+00> : vector<8x128xf32>
    %76 = tpu.matmul %75, %72, %cst_30 {dimension_numbers = #tpu.dot_dimension_numbers<[1], [0], [0], [1], [0, 0, 1, 1], [], []>} : vector<8x128xbf16>, vector<128x128xbf16>, vector<8x128xf32> -> vector<8x128xf32>
    %77 = vector.extract_strided_slice %74 {offsets = [0, 0], sizes = [1, 128], strides = [1, 1]} : vector<3x128xf32> to vector<1x128xf32>
    %78 = vector.extract_strided_slice %74 {offsets = [1, 0], sizes = [1, 128], strides = [1, 1]} : vector<3x128xf32> to vector<1x128xf32>
    %79 = vector.extract_strided_slice %74 {offsets = [2, 0], sizes = [1, 128], strides = [1, 1]} : vector<3x128xf32> to vector<1x128xf32>
    %80 = vector.broadcast %77 : vector<1x128xf32> to vector<8x128xf32>
    %81 = arith.addf %76, %80 : vector<8x128xf32>
    %cst_31 = arith.constant dense<0.000000e+00> : vector<8xf32>
    %82 = vector.multi_reduction <add>, %81, %cst_31 [1] : vector<8x128xf32> to vector<8xf32>
    %83 = vector.shape_cast %82 : vector<8xf32> to vector<8x1xf32>
    %cst_32 = arith.constant 3.125000e-02 : f32
    %84 = vector.broadcast %cst_32 : f32 to vector<8x1xf32>
    %85 = arith.mulf %83, %84 : vector<8x1xf32>
    %86 = arith.mulf %81, %81 : vector<8x128xf32>
    %cst_33 = arith.constant dense<0.000000e+00> : vector<8xf32>
    %87 = vector.multi_reduction <add>, %86, %cst_33 [1] : vector<8x128xf32> to vector<8xf32>
    %88 = vector.shape_cast %87 : vector<8xf32> to vector<8x1xf32>
    %cst_34 = arith.constant 3.125000e-02 : f32
    %89 = vector.broadcast %cst_34 : f32 to vector<8x1xf32>
    %90 = arith.mulf %88, %89 : vector<8x1xf32>
    %91 = arith.mulf %85, %85 : vector<8x1xf32>
    %92 = arith.subf %90, %91 : vector<8x1xf32>
    %cst_35 = arith.constant 9.99999974E-6 : f32
    %93 = vector.broadcast %cst_35 : f32 to vector<8x1xf32>
    %94 = arith.addf %92, %93 : vector<8x1xf32>
    %95 = math.rsqrt %94 : vector<8x1xf32>
    %96 = vector.broadcast %85 : vector<8x1xf32> to vector<8x128xf32>
    %97 = arith.subf %81, %96 : vector<8x128xf32>
    %98 = vector.broadcast %95 : vector<8x1xf32> to vector<8x128xf32>
    %99 = arith.mulf %97, %98 : vector<8x128xf32>
    %100 = vector.broadcast %78 : vector<1x128xf32> to vector<8x128xf32>
    %101 = arith.mulf %99, %100 : vector<8x128xf32>
    %102 = vector.broadcast %79 : vector<1x128xf32> to vector<8x128xf32>
    %103 = arith.addf %101, %102 : vector<8x128xf32>
    %cst_36 = arith.constant 0.000000e+00 : f32
    %104 = vector.broadcast %cst_36 : f32 to vector<8x128xf32>
    %105 = arith.maximumf %103, %104 : vector<8x128xf32>
    %c0_37 = arith.constant 0 : index
    %c0_38 = arith.constant 0 : index
    %106 = vector.load %arg4[%c0_37, %c0_38] : memref<8x128xf32, #tpu.memory_space<vmem>>, vector<8x128xf32>
    tpu.vector_store %arg4[%c0_37, %c0_38], %105 {strides = array<i32>} : memref<8x128xf32, #tpu.memory_space<vmem>>, vector<8x128xf32>,
    return
  }
  func.func @transform_0(%arg0: i32) -> (i32, i32) {
    %c0_i32 = arith.constant 0 : i32
    %c0_i32_0 = arith.constant 0 : i32
    return %arg0, %c0_i32 : i32, i32
  }
  func.func @transform_1(%arg0: i32) -> (i32, i32, i32) {
    %c0_i32 = arith.constant 0 : i32
    %c0_i32_0 = arith.constant 0 : i32
    %c0_i32_1 = arith.constant 0 : i32
    %c0_i32_2 = arith.constant 0 : i32
    return %c0_i32, %c0_i32_0, %c0_i32_1 : i32, i32, i32
  }
  func.func @transform_2(%arg0: i32) -> (i32, i32, i32) {
    %c0_i32 = arith.constant 0 : i32
    %c0_i32_0 = arith.constant 0 : i32
    %c0_i32_1 = arith.constant 0 : i32
    %c0_i32_2 = arith.constant 0 : i32
    return %c0_i32, %c0_i32_0, %c0_i32_1 : i32, i32, i32
  }
  func.func @transform_3(%arg0: i32) -> (i32, i32) {
    %c0_i32 = arith.constant 0 : i32
    %c0_i32_0 = arith.constant 0 : i32
    return %arg0, %c0_i32 : i32, i32
  }
}

</mosaic_0001>

<bundles_post_ra>
// kernel: mlp_forward.1
= control target key start
LH: loop header
LB: loop body
LE: loop exit
PB: predicated region body
PF: predicated region fallthrough
CT: control target
= control target key end

     0   :  { %8 = vsyncpa [#allocation3], 0  ;;  %s757_s0 = inlined_call_operand.vmem [shape: f32[8,128], index: 0, kind: input, shape index: {}]   ;;  %s758_s1 = inlined_call_operand.hbm [shape: bf16[3,128,128], index: 1, kind: input, shape index: {}]   ;;  %s759_s2 = inlined_call_operand.vmem [shape: f32[3,3,128], index: 2, kind: input, shape index: {}]   ;;  %s760_s3 = inlined_call_operand.hbm [shape: f32[8,128], index: 3, kind: output, shape index: {}]  }
   0x1   :  { %9 = vsyncpa [#allocation4], 0  ;;  %s650_s12 = smov [#allocation2]   ;;  %s602_s16 = scalar_lea.hbm %s758_s1, 3072 }
   0x2   :  { %s17_s13 = sshll.u32 %s650_s12, 4  ;;  %p603_p0 = scmp.ne.s32.totalorder %s758_s1, %s602_s16  ;;  %s18_s13 = int_to_ptr.vmem [resolvable:$true] %s17_s13 }
   0x3   :  { %p606_p1 = scmp.lt.u32.totalorder %s602_s16, %s758_s1 }
   0x5   :  { %p608_p2 = pnand %p606_p1, %p603_p0 }
   0x7   :  { %611 = shalt.err (!%p608_p2)
}
   0x8   :  { %s612_s21 = scalar_lea.vmem %s18_s13, 3072  ;;  %p617_p4 = scmp.lt.s32.totalorder %s18_s13, %s18_s13 }
   0x9   :  { %p613_p3 = scmp.ne.s32.totalorder %s18_s13, %s612_s21  ;;  %p618_p5 = scmp.lt.s32.totalorder %s612_s21, %s612_s21 }
   0xb   :  { %p619_p6 = por %p618_p5, %p617_p4 }
   0xd   :  { %p620_p7 = pnand %p619_p6, %p613_p3 }
   0xf   :  { %623 = shalt.err (!%p620_p7)
}
  0x10   :  { %s651_s22 = smov 64   ;;  %s652_s23 = smov 4  }
  0x11   :  { %23 = dma.hbm_to_vmem [thread:$0]  %s758_s1, 3072, %s18_s13, [#allocation3], %s651_s22, %s651_s22, %s652_s23  }
  0x12   :  { %646 = dma.done.wait [#allocation3], 3072  }
  0x13   :  { %647 = vsyncadd [#allocation3], 4294964224  ;;  %v653_v0 = vmov 0.0   ;;  %vm654_vm0 = vmmov 0   ;;  %v572_v1 = vld [vmem:[#allocation2] sm:$0xff]   ;;  %v573_v2 = vld [vmem:[#allocation2 + $0x8] sm:$0xff]   ;;  %v49_v11 = vlaneseq }
  0x14   :  { %506 = vmatprep.subr.bf16.mxu0 %v653_v0  ;;  %522 = vmatprep.mubr.msk.bf16.mxu0 %vm654_vm0, %v653_v0  ;;  %v574_v3 = vld [vmem:[#allocation2 + $0x10] sm:$0xff]   ;;  %v575_v4 = vld [vmem:[#allocation2 + $0x18] sm:$0xff]   ;;  %v576_v5 = vld [vmem:[#allocation2 + $0x20] sm:$0xff]  }
  0x15   :  { %526 = vmatprep.subr.bf16.mxu1 %v653_v0  ;;  %542 = vmatprep.mubr.msk.bf16.mxu1 %vm654_vm0, %v653_v0  ;;  %v577_v6 = vld [vmem:[#allocation2 + $0x28] sm:$0xff]   ;;  %v578_v7 = vld [vmem:[#allocation2 + $0x30] sm:$0xff]   ;;  %v579_v8 = vld [vmem:[#allocation2 + $0x38] sm:$0xff]   ;;  %v50_v12 = vshrl.u32 %v49_v11, 7 }
  0x16   :  { %507 = vmatpush3.bf16.msra.mxu0 %v572_v1  ;;  %v30_v9 = vld [vmem:[%s757_s0] sm:$0xff]  ;;  %v581_v23 = vld [vmem:[#allocation2 + $0x48] sm:$0xff]   ;;  %v582_v24 = vld [vmem:[#allocation2 + $0x50] sm:$0xff]  }
  0x17   :  { %508 = vmatprep.subr.bf16.mxu0 %v653_v0  ;;  %v48_v10 = vpack.c.bf16 %v30_v9, %v30_v9  ;;  %v707_v13 = vsub.s32 0, %v50_v12  ;;  %v47_v14 = vld [vmem:[%s759_s2] sm:$0x7]  ;;  %v583_v25 = vld [vmem:[#allocation2 + $0x58] sm:$0xff]   ;;  %v585_v27 = vld [vmem:[#allocation2 + $0x68] sm:$0xff]   ;;  %v720_v37 = vsub.s32 1, %v50_v12 }
  0x18   :  { %v580_v22 = vld [vmem:[#allocation2 + $0x40] sm:$0xff]   ;;  %v586_v28 = vld [vmem:[#allocation2 + $0x70] sm:$0xff]   ;;  %v587_v29 = vld [vmem:[#allocation2 + $0x78] sm:$0xff]   ;;  %v722_v38 = vsub.s32 2, %v50_v12 }
  0x19   :  { %v52_v15 = vrot.slane %v47_v14, %v707_v13  ;;  %527 = vmatpush3.bf16.msra.mxu1 %v580_v22  ;;  %v584_v26 = vld [vmem:[#allocation2 + $0x60] sm:$0xff]   ;;  %v157_v39 = vrot.slane %v47_v14, %v720_v37  ;;  %v589_v57 = vld [vmem:[#allocation2 + $0x88] sm:$0xff]   ;;  %v590_v58 = vld [vmem:[#allocation2 + $0x90] sm:$0xff]  }
  0x1a   :  { %509 = vmatpush3.bf16.msra.mxu0 %v573_v2  ;;  %528 = vmatprep.subr.bf16.mxu1 %v653_v0  ;;  %v162_v43 = vrot.slane %v47_v14, %v722_v38  ;;  %v461_v48 = vld [vmem:[%s759_s2 + $0x4] sm:$0x7]  ;;  %v591_v59 = vld [vmem:[#allocation2 + $0x98] sm:$0xff]   ;;  %v593_v61 = vld [vmem:[#allocation2 + $0xa8] sm:$0xff]  }
  0x1b   :  { %510 = vmatprep.subr.bf16.mxu0 %v653_v0  ;;  %v188_v49 = vrot.slane %v461_v48, %v707_v13  ;;  %v588_v56 = vld [vmem:[#allocation2 + $0x80] sm:$0xff]   ;;  %v594_v62 = vld [vmem:[#allocation2 + $0xb0] sm:$0xff]   ;;  %v595_v63 = vld [vmem:[#allocation2 + $0xb8] sm:$0xff]   ;;  %v298_v11 = vrot.slane %v461_v48, %v722_v38 }
  0x1c   :  { %v592_v60 = vld [vmem:[#allocation2 + $0xa0] sm:$0xff]  }
  0x1d   :  { %529 = vmatpush3.bf16.msra.mxu1 %v581_v23 }
  0x1e   :  { %511 = vmatpush3.bf16.msra.mxu0 %v574_v3  ;;  %530 = vmatprep.subr.bf16.mxu1 %v653_v0 }
  0x1f   :  { %512 = vmatprep.subr.bf16.mxu0 %v653_v0 }
  0x21   :  { %531 = vmatpush3.bf16.msra.mxu1 %v582_v24 }
  0x22   :  { %513 = vmatpush3.bf16.msra.mxu0 %v575_v4  ;;  %532 = vmatprep.subr.bf16.mxu1 %v653_v0 }
  0x23   :  { %514 = vmatprep.subr.bf16.mxu0 %v653_v0 }
  0x25   :  { %533 = vmatpush3.bf16.msra.mxu1 %v583_v25 }
  0x26   :  { %515 = vmatpush3.bf16.msra.mxu0 %v576_v5  ;;  %534 = vmatprep.subr.bf16.mxu1 %v653_v0 }
  0x27   :  { %516 = vmatprep.subr.bf16.mxu0 %v653_v0 }
  0x29   :  { %535 = vmatpush3.bf16.msra.mxu1 %v584_v26 }
  0x2a   :  { %517 = vmatpush3.bf16.msra.mxu0 %v577_v6  ;;  %536 = vmatprep.subr.bf16.mxu1 %v653_v0 }
  0x2b   :  { %518 = vmatprep.subr.bf16.mxu0 %v653_v0 }
  0x2d   :  { %537 = vmatpush3.bf16.msra.mxu1 %v585_v27 }
  0x2e   :  { %519 = vmatpush3.bf16.msra.mxu0 %v578_v7  ;;  %538 = vmatprep.subr.bf16.mxu1 %v653_v0 }
  0x2f   :  { %520 = vmatprep.subr.bf16.mxu0 %v653_v0 }
  0x31   :  { %539 = vmatpush3.bf16.msra.mxu1 %v586_v28 }
  0x32   :  { %521 = vmatpush3.bf16.msra.mxu0 %v579_v8  ;;  %540 = vmatprep.subr.bf16.mxu1 %v653_v0  ;;  %v293_v8 = vrot.slane %v461_v48, %v720_v37 }
  0x33   :  { %546 = vmatprep.subr.bf16.mxu0 %v653_v0 }
  0x35   :  { %523 = vmatmul.mubr.bf16.vlgmr.msra.gmra.mrb[0].mxu0 %v48_v10  ;;  %541 = vmatpush3.bf16.msra.mxu1 %v587_v29 }
  0x36   :  { %562 = vmatprep.mubr.msk.bf16.mxu0 %vm654_vm0, %v653_v0  ;;  %547 = vmatpush3.bf16.msra.mxu0 %v588_v56 }
  0x37   :  { %548 = vmatprep.subr.bf16.mxu0 %v653_v0 }
  0x3a   :  { %549 = vmatpush3.bf16.msra.mxu0 %v589_v57 }
  0x3b   :  { %550 = vmatprep.subr.bf16.mxu0 %v653_v0 }
  0x3e   :  { %551 = vmatpush3.bf16.msra.mxu0 %v590_v58 }
  0x3f   :  { %552 = vmatprep.subr.bf16.mxu0 %v653_v0 }
  0x42   :  { %553 = vmatpush3.bf16.msra.mxu0 %v591_v59 }
  0x43   :  { %554 = vmatprep.subr.bf16.mxu0 %v653_v0 }
  0x46   :  { %555 = vmatpush3.bf16.msra.mxu0 %v592_v60 }
  0x47   :  { %556 = vmatprep.subr.bf16.mxu0 %v653_v0 }
  0x4a   :  { %557 = vmatpush3.bf16.msra.mxu0 %v593_v61 }
  0x4b   :  { %558 = vmatprep.subr.bf16.mxu0 %v653_v0 }
  0x4e   :  { %559 = vmatpush3.bf16.msra.mxu0 %v594_v62 }
  0x4f   :  { %560 = vmatprep.subr.bf16.mxu0 %v653_v0 }
  0x52   :  { %561 = vmatpush3.bf16.msra.mxu0 %v595_v63 }
 0x108   :  { %v135_v16 = vpop.f32.mrb[0].mxu0 }
 0x109   :  { %v136_v17 = vadd.f32 %v135_v16, %v52_v15  ;;  %v524_v18 = vpop.f32.mrb[1].mxu0 }
 0x10a   :  { %v138_v19 = vpop.f32.mrb[2].mxu0 }
 0x10b   :  { %141 = vadd.xlane.f32.xlu0 %v136_v17  ;;  %v525_v20 = vpop.f32.mrb[3].mxu0  ;;  %v144_v21 = vmul.f32 %v136_v17, %v136_v17 }
 0x10f   :  { %145 = vadd.xlane.f32.xlu0 %v144_v21 }
 0x198   :  { %v142_v30 = vpop.xlane.xlu0 %141 }
 0x199   :  { %v143_v31 = vmul.f32 0.03125, %v142_v30 }
 0x19b   :  { %v148_v33 = vmul.f32 %v143_v31, %v143_v31  ;;  %v152_v40 = vsub.f32 %v136_v17, %v143_v31  ;;  %v470_v17 = vld [vmem:[%s759_s2 + $0x8] sm:$0x7]  ;;  %s655_s2 = smov [#allocation5]  }
 0x19c   :  { %v146_v32 = vpop.xlane.xlu0 %145  ;;  %v324_v18 = vrot.slane %v470_v17, %v707_v13  ;;  %s444_s5 = sshll.u32 %s655_s2, 4  ;;  %s445_s5 = int_to_ptr.vmem [resolvable:$true] %s444_s5 }
 0x19d   :  { %v147_v34 = vmul.f32 0.03125, %v146_v32  ;;  %v429_v32 = vrot.slane %v470_v17, %v720_v37  ;;  %s624_s6 = scalar_lea.vmem %s445_s5, 128  ;;  %p629_p9 = scmp.lt.s32.totalorder %s445_s5, %s445_s5 }
 0x19e   :  { %p625_p8 = scmp.ne.s32.totalorder %s445_s5, %s624_s6  ;;  %p630_p10 = scmp.lt.s32.totalorder %s624_s6, %s624_s6 }
 0x19f   :  { %v149_v35 = vsub.f32 %v147_v34, %v148_v33 }
 0x1a0   :  { %p631_p11 = por %p630_p10, %p629_p9 }
 0x1a1   :  { %v150_v36 = vadd.f32 1e-05, %v149_v35  ;;  %v434_v35 = vrot.slane %v470_v17, %v722_v38 }
 0x1a2   :  { %p632_p12 = pnand %p631_p11, %p625_p8 }
 0x1a3   :  { %596 = vrsqrt.f32 %v150_v36 }
 0x1ad   :  { %v597_v41 = vpop.eup %596 }
 0x1ae   :  { %v153_v42 = vmul.f32 %v597_v41, %v152_v40 }
 0x1b0   :  { %v158_v44 = vmul.f32 %v157_v39, %v153_v42 }
 0x1b2   :  { %v163_v45 = vadd.f32 %v162_v43, %v158_v44 }
 0x1b4   :  { %v164_v46 = vmax.f32 %v163_v45, 0.0 }
 0x1b6   :  { %v184_v47 = vpack.c.bf16 %v164_v46, %v164_v46 }
 0x1b8   :  { %543 = vmatmul.mubr.bf16.vlgmr.msra.gmra.mrb[0].mxu1 %v184_v47 }
 0x28b   :  { %v271_v50 = vpop.f32.mrb[0].mxu1 }
 0x28c   :  { %v272_v51 = vadd.f32 %v271_v50, %v188_v49  ;;  %v544_v52 = vpop.f32.mrb[1].mxu1 }
 0x28d   :  { %v274_v53 = vpop.f32.mrb[2].mxu1 }
 0x28e   :  { %277 = vadd.xlane.f32.xlu1 %v272_v51  ;;  %v545_v54 = vpop.f32.mrb[3].mxu1  ;;  %v280_v55 = vmul.f32 %v272_v51, %v272_v51 }
 0x292   :  { %281 = vadd.xlane.f32.xlu1 %v280_v55 }
 0x31b   :  { %v278_v1 = vpop.xlane.xlu1 %277 }
 0x31c   :  { %v279_v2 = vmul.f32 0.03125, %v278_v1 }
 0x31e   :  { %v284_v4 = vmul.f32 %v279_v2, %v279_v2  ;;  %v288_v9 = vsub.f32 %v272_v51, %v279_v2 }
 0x31f   :  { %v282_v3 = vpop.xlane.xlu1 %281 }
 0x320   :  { %v283_v5 = vmul.f32 0.03125, %v282_v3 }
 0x322   :  { %v285_v6 = vsub.f32 %v283_v5, %v284_v4 }
 0x324   :  { %v286_v7 = vadd.f32 1e-05, %v285_v6 }
 0x326   :  { %598 = vrsqrt.f32 %v286_v7 }
 0x330   :  { %v599_v10 = vpop.eup %598 }
 0x331   :  { %v289_v12 = vmul.f32 %v599_v10, %v288_v9 }
 0x333   :  { %v294_v14 = vmul.f32 %v293_v8, %v289_v12 }
 0x335   :  { %v299_v15 = vadd.f32 %v298_v11, %v294_v14 }
 0x337   :  { %v300_v16 = vmax.f32 %v299_v15, 0.0 }
 0x339   :  { %v320_v0 = vpack.c.bf16 %v300_v16, %v300_v16 }
 0x33b   :  { %563 = vmatmul.mubr.bf16.vlgmr.msra.gmra.mrb[4].mxu0 %v320_v0 }
 0x40e   :  { %v407_v19 = vpop.f32.mrb[4].mxu0 }
 0x40f   :  { %v408_v20 = vadd.f32 %v407_v19, %v324_v18  ;;  %v564_v21 = vpop.f32.mrb[5].mxu0 }
 0x410   :  { %v410_v22 = vpop.f32.mrb[6].mxu0 }
 0x411   :  { %413 = vadd.xlane.f32.xlu0 %v408_v20  ;;  %v565_v23 = vpop.f32.mrb[7].mxu0  ;;  %v416_v24 = vmul.f32 %v408_v20, %v408_v20 }
 0x413   :  { %417 = vadd.xlane.f32.xlu1 %v416_v24 }
 0x49e   :  { %v414_v25 = vpop.xlane.xlu0 %413 }
 0x49f   :  { %v415_v26 = vmul.f32 0.03125, %v414_v25 }
 0x4a0   :  { %v418_v27 = vpop.xlane.xlu1 %417 }
 0x4a1   :  { %v420_v28 = vmul.f32 %v415_v26, %v415_v26  ;;  %v419_v29 = vmul.f32 0.03125, %v418_v27  ;;  %v424_v33 = vsub.f32 %v408_v20, %v415_v26 }
 0x4a3   :  { %v421_v30 = vsub.f32 %v419_v29, %v420_v28 }
 0x4a5   :  { %v422_v31 = vadd.f32 1e-05, %v421_v30 }
 0x4a7   :  { %600 = vrsqrt.f32 %v422_v31 }
 0x4b1   :  { %v601_v13 = vpop.eup %600 }
 0x4b2   :  { %v425_v34 = vmul.f32 %v601_v13, %v424_v33 }
 0x4b4   :  { %v430_v36 = vmul.f32 %v429_v32, %v425_v34 }
 0x4b6   :  { %v435_v39 = vadd.f32 %v434_v35, %v430_v36 }
 0x4b8   :  { %v436_v40 = vmax.f32 %v435_v39, 0.0 }
 0x4ba   :  { %437 = vst [vmem:[#allocation5] sm:$0xff] %v436_v40 }
 0x4bb   :  { %635 = shalt.err (!%p632_p12)
}
 0x4bc   :  { %s636_s9 = scalar_lea.hbm %s760_s3, 128 }
 0x4bd   :  { %p637_p13 = scmp.ne.s32.totalorder %s760_s3, %s636_s9  ;;  %p640_p0 = scmp.lt.u32.totalorder %s636_s9, %s760_s3 }
 0x4bf   :  { %p642_p1 = pnand %p640_p0, %p637_p13 }
 0x4c1   :  { %645 = shalt.err (!%p642_p1)
}
 0x4c2   :  { %447 = dma.vmem_to_hbm [thread:$0]  %s445_s5, 128, %s760_s3, [#allocation4]  }
 0x4c3   :  { %648 = dma.done.wait [#allocation4], 128  }
 0x4c4   :  { %649 = vsyncadd [#allocation4], 4294967168 }
 0x4c5   :  { %451 = vsyncpa [#allocation3], 1 }
 0x4c6   :  { %452 = vsyncpa [#allocation4], 1 }

</bundles_post_ra>
